<compile_context>
chip_gen: v5e
topology: v5e:2x2
jax: 0.10.0
libtpu: 0.0.40
codegen_flags: <defaults>
</compile_context>

<pallas_src>
import functools

import jax
import jax.numpy as jnp
from jax import lax
from jax.experimental import pallas as pl
from jax.experimental.pallas import tpu as pltpu


# ----------------------------- Pallas kernel ------------------------------ #
def _rem_kernel(x_ref, halo_ref, w_ref, b_ref, o_ref, xe_ref, *, Cp, W, THW, HLO):
    """One (batch, spatial-tile) grid step.

    x_ref   : (1, Cp, THW)       input tile, channels x flattened spatial
    halo_ref: (1, 1, Cp, 2*HLO)  W+1 flat elements before / after the tile
    w_ref   : (2*Cp, 9*Cp)       fused, BN-folded weights (f32)
    b_ref   : (2*Cp, 1)          fused, BN-folded biases  (f32)
    o_ref   : (1, Cp, THW)       output tile
    xe_ref  : (Cp, THW + 2*HLO)  f32 VMEM scratch: [halo_pre | x | halo_post]
    """
    x = x_ref[0].astype(jnp.float32)                       # (Cp, THW)
    hal = halo_ref[0, 0].astype(jnp.float32)               # (Cp, 2*HLO)

    # Stage the extended tile into VMEM scratch (flat-HW coordinates).
    xe_ref[:, 0:HLO] = hal[:, 0:HLO]
    xe_ref[:, HLO:HLO + THW] = x
    xe_ref[:, HLO + THW:HLO + THW + HLO] = hal[:, HLO:2 * HLO]

    # Column-within-row index for the width-direction (pad=1) masks.
    col = lax.broadcasted_iota(jnp.int32, (1, THW), 1) % W
    not_left = col != 0            # valid positions when dx == -1
    not_right = col != (W - 1)     # valid positions when dx == +1

    # Build the 9 shifted taps (tap k = (dy+1)*3 + (dx+1), channel inner).
    taps = []
    for dy in (-1, 0, 1):
        for dx in (-1, 0, 1):
            if dy == 0 and dx == 0:
                taps.append(x)                             # centre tap == x
                continue
            start = HLO + dy * W + dx                      # static offset
            t = xe_ref[:, start:start + THW]
            if dx == -1:
                t = jnp.where(not_left, t, 0.0)
            elif dx == 1:
                t = jnp.where(not_right, t, 0.0)
            taps.append(t)
    patches = jnp.concatenate(taps, axis=0)                # (9*Cp, THW)

    # Single fused MXU matmul for both branches.
    y = jnp.dot(w_ref[...], patches, preferred_element_type=jnp.float32)
    y = y + b_ref[...]                                     # (2*Cp, THW)

    logit = jax.nn.sigmoid(y[:Cp])                         # logit branch
    res = jnp.clip(y[Cp:], 0.0, 6.0)                       # ReLU6 branch
    o_ref[0] = (x * logit + res).astype(o_ref.dtype)


# ------------------------------- wrapper ----------------------------------- #
def _pick_tile_rows(H, W, max_lanes):
    """Largest TH dividing H with TH*W a multiple of 128 and <= max_lanes."""
    cand = [d for d in range(1, H + 1)
            if H % d == 0 and (d * W) % 128 == 0 and d * W <= max_lanes]
    return max(cand) if cand else H


@functools.partial(jax.jit, static_argnames=("io_dtype", "max_lanes"))
def residual_encoded_forward(xs, params, *, io_dtype=jnp.float32, max_lanes=2048):
    """xs: (B, C, H, W) float32, NCHW (PyTorch convention). Returns NCHW."""
    B, C, H, W = xs.shape
    HW = H * W
    eps = 1e-5

    # Channel padding to a sublane multiple (8 for f32 I/O, 16 for bf16 I/O).
    cmul = 16 if io_dtype == jnp.bfloat16 else 8
    Cp = ((C + cmul - 1) // cmul) * cmul

    # ---- fold eval-mode BatchNorm into the conv weights / biases ----
    def fold(w_oihw, b_conv, gamma, beta, mean, var):
        s = gamma / jnp.sqrt(var + eps)
        return w_oihw * s[:, None, None, None], (b_conv - mean) * s + beta

    w1_f, b1_f = fold(params["w1"], params["b1"], params["bn1_g"],
                      params["bn1_b"], params["bn1_m"], params["bn1_v"])
    w3_f, b3_f = fold(params["w3"], params["b3"], params["bn3_g"],
                      params["bn3_b"], params["bn3_m"], params["bn3_v"])

    # ---- fused weight: rows [0,Cp) = logit branch, rows [Cp,2Cp) = residual.
    # Patch-operand column order: tap k = ky*3+kx outer, input channel inner.
    w1_mat = w1_f[:, :, 0, 0].astype(jnp.float32)                      # (C, C)
    w3_k = jnp.transpose(w3_f, (2, 3, 0, 1)).reshape(9, C, C).astype(jnp.float32)
    wcat = jnp.zeros((2 * Cp, 9 * Cp), jnp.float32)
    wcat = wcat.at[0:C, 4 * Cp:4 * Cp + C].set(w1_mat)        # centre tap only
    for k in range(9):
        wcat = wcat.at[Cp:Cp + C, k * Cp:k * Cp + C].set(w3_k[k])
    bcat = jnp.zeros((2 * Cp,), jnp.float32)
    bcat = bcat.at[0:C].set(b1_f).at[Cp:Cp + C].set(b3_f).reshape(2 * Cp, 1)

    # ---- layout: pad channels, flatten spatial, build tiny per-tile halos ---
    TH = _pick_tile_rows(H, W, max_lanes)
    THW = TH * W
    num_t = HW // THW
    HLO = W + 1                                    # halo: one row +/- one elt

    x_flat = jnp.pad(xs, ((0, 0), (0, Cp - C), (0, 0), (0, 0))).reshape(B, Cp, HW)
    x_io = x_flat.astype(io_dtype)
    flat_p = jnp.pad(x_flat, ((0, 0), (0, 0), (HLO, HLO)))
    halos = jnp.stack(
        [jnp.concatenate(
            [flat_p[:, :, t * THW:t * THW + HLO],
             flat_p[:, :, (t + 1) * THW + HLO:(t + 1) * THW + 2 * HLO]],
            axis=-1) for t in range(num_t)],
        axis=1).astype(io_dtype)                   # (B, num_t, Cp, 2*HLO)

    kern = functools.partial(_rem_kernel, Cp=Cp, W=W, THW=THW, HLO=HLO)

    flops = 2 * (2 * Cp) * (9 * Cp) * B * HW + 4 * B * Cp * HW
    bytes_accessed = (x_io.size * x_io.dtype.itemsize
                      + halos.size * halos.dtype.itemsize
                      + wcat.size * 4 + bcat.size * 4
                      + B * Cp * HW * xs.dtype.itemsize)
    cost = pl.CostEstimate(flops=int(flops),
                           transcendentals=int(B * Cp * HW),
                           bytes_accessed=int(bytes_accessed))

    out_flat = pl.pallas_call(
        kern,
        out_shape=jax.ShapeDtypeStruct((B, Cp, HW), xs.dtype),
        grid_spec=pltpu.PrefetchScalarGridSpec(
            num_scalar_prefetch=0,
            grid=(B, num_t),
            in_specs=[
                pl.BlockSpec((1, Cp, THW), lambda b, t: (b, 0, t)),
                pl.BlockSpec((1, 1, Cp, 2 * HLO), lambda b, t: (b, t, 0, 0)),
                pl.BlockSpec((2 * Cp, 9 * Cp), lambda b, t: (0, 0)),
                pl.BlockSpec((2 * Cp, 1), lambda b, t: (0, 0)),
            ],
            out_specs=pl.BlockSpec((1, Cp, THW), lambda b, t: (b, 0, t)),
            scratch_shapes=[pltpu.VMEM((Cp, THW + 2 * HLO), jnp.float32)],
        ),
        compiler_params=pltpu.CompilerParams(
            dimension_semantics=("parallel", "parallel"),
            vmem_limit_bytes=32 * 1024 * 1024,
        ),
        cost_estimate=cost,
    )(x_io, halos, wcat, bcat)

    return out_flat[:, :C, :].reshape(B, C, H, W)


# ------------------------- pure-JAX reference ------------------------------ #
def residual_encoded_reference(xs, params):
    eps = 1e-5

    def conv(x, w, b, pad):
        y = lax.conv_general_dilated(
            x, w, window_strides=(1, 1),
            padding=((pad, pad), (pad, pad)),
            dimension_numbers=("NCHW", "OIHW", "NCHW"),
        )
        return y + b[None, :, None, None]

    def bn(x, g, bta, m, v):
        return ((x - m[None, :, None, None])
                / jnp.sqrt(v[None, :, None, None] + eps)
                * g[None, :, None, None] + bta[None, :, None, None])

    logit = jax.nn.sigmoid(
        bn(conv(xs, params["w1"], params["b1"], 0),
           params["bn1_g"], params["bn1_b"], params["bn1_m"], params["bn1_v"]))
    res = jnp.clip(
        bn(conv(xs, params["w3"], params["b3"], 1),
           params["bn3_g"], params["bn3_b"], params["bn3_m"], params["bn3_v"]),
        0.0, 6.0)
    return xs * logit + res


# --------------------------------- main ------------------------------------ #
if __name__ == "__main__":
    B, C, H, W = 2, 4, 16, 16  # cs = 4

    key = jax.random.PRNGKey(0)
    ks = jax.random.split(key, 13)

    params = {
        # logit branch: Conv2d(C, C, k=1) + BatchNorm2d(C)
        "w1": jax.random.normal(ks[0], (C, C, 1, 1), jnp.float32) * 0.3,
        "b1": jax.random.normal(ks[1], (C,), jnp.float32) * 0.1,
        "bn1_g": 1.0 + 0.1 * jax.random.normal(ks[2], (C,), jnp.float32),
        "bn1_b": 0.1 * jax.random.normal(ks[3], (C,), jnp.float32),
        "bn1_m": 0.1 * jax.random.normal(ks[4], (C,), jnp.float32),
        "bn1_v": 0.5 + jnp.abs(jax.random.normal(ks[5], (C,), jnp.float32)),
        # residual branch: Conv2d(C, C, k=3, pad=1) + BatchNorm2d(C)
        "w3": jax.random.normal(ks[6], (C, C, 3, 3), jnp.float32) * 0.2,
        "b3": jax.random.normal(ks[7], (C,), jnp.float32) * 0.1,
        "bn3_g": 1.0 + 0.1 * jax.random.normal(ks[8], (C,), jnp.float32),
        "bn3_b": 0.1 * jax.random.normal(ks[9], (C,), jnp.float32),
        "bn3_m": 0.1 * jax.random.normal(ks[10], (C,), jnp.float32),
        "bn3_v": 0.5 + jnp.abs(jax.random.normal(ks[11], (C,), jnp.float32)),
    }

    xs = jax.random.normal(ks[12], (B, C, H, W), jnp.float32)

    ref = residual_encoded_reference(xs, params)

    # f32 I/O, spatial axis tiled into two 128-lane blocks (grid = (2, 2)).
    out = jax.block_until_ready(
        residual_encoded_forward(xs, params, max_lanes=128))
    assert out.shape == (B, C, H, W)
    assert jnp.allclose(out, ref, rtol=2e-4, atol=2e-4), (
        "Pallas kernel output mismatch vs reference (f32, tiled)")

    # f32 I/O, single spatial tile per batch element (grid = (2, 1)).
    out1 = jax.block_until_ready(residual_encoded_forward(xs, params))
    assert jnp.allclose(out1, ref, rtol=2e-4, atol=2e-4), (
        "Pallas kernel output mismatch vs reference (f32, single tile)")

    # bf16 I/O for the bandwidth-dominant x / halo streams (looser tolerance).
    out_bf = jax.block_until_ready(
        residual_encoded_forward(xs, params, io_dtype=jnp.bfloat16,
                                 max_lanes=128))
    assert jnp.allclose(out_bf, ref, rtol=1e-1, atol=1e-1), (
        "Pallas kernel output mismatch vs reference (bf16 I/O)")

    print("KERNEL_OK")
</pallas_src>

<mosaic_0001>
module attributes {stable_mosaic.version = 11 : i64} {
  func.func @_rem_kernel(%arg0: i32, %arg1: i32, %arg2: memref<1x8x128xf32, #tpu.memory_space<vmem>>, %arg3: memref<1x1x8x34xf32, #tpu.memory_space<vmem>>, %arg4: memref<16x72xf32, #tpu.memory_space<vmem>>, %arg5: memref<16x1xf32, #tpu.memory_space<vmem>>, %arg6: memref<1x8x128xf32, #tpu.memory_space<vmem>>, %arg7: memref<8x162xf32, #tpu.memory_space<vmem>>) attributes {dimension_semantics = [#tpu.dimension_semantics<parallel>, #tpu.dimension_semantics<parallel>], iteration_bounds = array<i64: 2, 2>, scalar_prefetch = 0 : i64, scratch_operands = 1 : i64, tpu.core_type = #tpu.core_type<tc>, window_params = [{transform_indices = @transform_0, window_bounds = array<i64: 1, 8, 128>}, {transform_indices = @transform_1, window_bounds = array<i64: 1, 1, 8, 34>}, {pipeline_mode = #tpu.pipeline_mode<synchronous>, transform_indices = @transform_2, window_bounds = array<i64: 16, 72>}, {pipeline_mode = #tpu.pipeline_mode<synchronous>, transform_indices = @transform_3, window_bounds = array<i64: 16, 1>}, {transform_indices = @transform_4, window_bounds = array<i64: 1, 8, 128>}]} {
    %c0 = arith.constant 0 : index
    %c0_0 = arith.constant 0 : index
    %c0_1 = arith.constant 0 : index
    %0 = vector.load %arg2[%c0, %c0_0, %c0_1] : memref<1x8x128xf32, #tpu.memory_space<vmem>>, vector<1x8x128xf32>
    %1 = vector.shape_cast %0 : vector<1x8x128xf32> to vector<8x128xf32>
    %c0_2 = arith.constant 0 : index
    %c0_3 = arith.constant 0 : index
    %c0_4 = arith.constant 0 : index
    %c0_5 = arith.constant 0 : index
    %2 = vector.load %arg3[%c0_2, %c0_3, %c0_4, %c0_5] : memref<1x1x8x34xf32, #tpu.memory_space<vmem>>, vector<1x1x8x34xf32>
    %3 = vector.shape_cast %2 : vector<1x1x8x34xf32> to vector<8x34xf32>
    %4 = vector.extract_strided_slice %3 {offsets = [0, 0], sizes = [8, 17], strides = [1, 1]} : vector<8x34xf32> to vector<8x17xf32>
    %c0_6 = arith.constant 0 : index
    %c0_7 = arith.constant 0 : index
    %5 = vector.load %arg7[%c0_6, %c0_7] : memref<8x162xf32, #tpu.memory_space<vmem>>, vector<8x17xf32>
    tpu.vector_store %arg7[%c0_6, %c0_7], %4 {strides = array<i32>} : memref<8x162xf32, #tpu.memory_space<vmem>>, vector<8x17xf32>,
    %c0_8 = arith.constant 0 : index
    %c17 = arith.constant 17 : index
    %6 = vector.load %arg7[%c0_8, %c17] : memref<8x162xf32, #tpu.memory_space<vmem>>, vector<8x128xf32>
    tpu.vector_store %arg7[%c0_8, %c17], %1 {strides = array<i32>} : memref<8x162xf32, #tpu.memory_space<vmem>>, vector<8x128xf32>,
    %7 = vector.extract_strided_slice %3 {offsets = [0, 17], sizes = [8, 17], strides = [1, 1]} : vector<8x34xf32> to vector<8x17xf32>
    %c0_9 = arith.constant 0 : index
    %c145 = arith.constant 145 : index
    %8 = vector.load %arg7[%c0_9, %c145] : memref<8x162xf32, #tpu.memory_space<vmem>>, vector<8x17xf32>
    tpu.vector_store %arg7[%c0_9, %c145], %7 {strides = array<i32>} : memref<8x162xf32, #tpu.memory_space<vmem>>, vector<8x17xf32>,
    %9 = tpu.iota {dimensions = array<i32: 1>} : vector<1x128xi32>
    %c16_i32 = arith.constant 16 : i32
    %c0_i32 = arith.constant 0 : i32
    %10 = arith.cmpi eq, %c16_i32, %c0_i32 : i32
    %c1_i32 = arith.constant 1 : i32
    %11 = arith.select %10, %c1_i32, %c16_i32 : i32
    %12 = vector.broadcast %11 : i32 to vector<1x128xi32>
    %13 = arith.remsi %9, %12 : vector<1x128xi32>
    %c0_i32_10 = arith.constant 0 : i32
    %14 = vector.broadcast %c0_i32_10 : i32 to vector<1x128xi32>
    %15 = arith.cmpi ne, %13, %14 : vector<1x128xi32>
    %c0_i32_11 = arith.constant 0 : i32
    %16 = vector.broadcast %c0_i32_11 : i32 to vector<1x128xi32>
    %17 = arith.cmpi slt, %13, %16 : vector<1x128xi32>
    %c0_i32_12 = arith.constant 0 : i32
    %18 = arith.cmpi slt, %11, %c0_i32_12 : i32
    %19 = vector.broadcast %18 : i1 to vector<1x128xi1>
    %20 = vector.broadcast %19 : vector<1x128xi1> to vector<1x128xi1>
    %21 = arith.xori %17, %20 : vector<1x128xi1>
    %22 = arith.andi %21, %15 : vector<1x128xi1>
    %23 = vector.broadcast %11 : i32 to vector<1x128xi32>
    %24 = arith.addi %13, %23 : vector<1x128xi32>
    %25 = arith.select %22, %24, %13 : vector<1x128xi1>, vector<1x128xi32>
    %c0_i32_13 = arith.constant 0 : i32
    %26 = vector.broadcast %c0_i32_13 : i32 to vector<1x128xi32>
    %27 = arith.cmpi ne, %25, %26 : vector<1x128xi32>
    %c15_i32 = arith.constant 15 : i32
    %28 = vector.broadcast %c15_i32 : i32 to vector<1x128xi32>
    %29 = arith.cmpi ne, %25, %28 : vector<1x128xi32>
    %c0_14 = arith.constant 0 : index
    %c0_15 = arith.constant 0 : index
    %30 = vector.load %arg7[%c0_14, %c0_15] : memref<8x162xf32, #tpu.memory_space<vmem>>, vector<8x128xf32>
    %cst = arith.constant 0.000000e+00 : f32
    %31 = vector.shape_cast %27 : vector<1x128xi1> to vector<1x128xi1>
    %32 = vector.broadcast %31 : vector<1x128xi1> to vector<8x128xi1>
    %33 = vector.broadcast %cst : f32 to vector<8x128xf32>
    %34 = arith.select %32, %30, %33 : vector<8x128xi1>, vector<8x128xf32>
    %c0_16 = arith.constant 0 : index
    %c1 = arith.constant 1 : index
    %35 = vector.load %arg7[%c0_16, %c1] : memref<8x162xf32, #tpu.memory_space<vmem>>, vector<8x128xf32>
    %c0_17 = arith.constant 0 : index
    %c2 = arith.constant 2 : index
    %36 = vector.load %arg7[%c0_17, %c2] : memref<8x162xf32, #tpu.memory_space<vmem>>, vector<8x128xf32>
    %cst_18 = arith.constant 0.000000e+00 : f32
    %37 = vector.shape_cast %29 : vector<1x128xi1> to vector<1x128xi1>
    %38 = vector.broadcast %37 : vector<1x128xi1> to vector<8x128xi1>
    %39 = vector.broadcast %cst_18 : f32 to vector<8x128xf32>
    %40 = arith.select %38, %36, %39 : vector<8x128xi1>, vector<8x128xf32>
    %c0_19 = arith.constant 0 : index
    %c16 = arith.constant 16 : index
    %41 = vector.load %arg7[%c0_19, %c16] : memref<8x162xf32, #tpu.memory_space<vmem>>, vector<8x128xf32>
    %cst_20 = arith.constant 0.000000e+00 : f32
    %42 = vector.shape_cast %27 : vector<1x128xi1> to vector<1x128xi1>
    %43 = vector.broadcast %42 : vector<1x128xi1> to vector<8x128xi1>
    %44 = vector.broadcast %cst_20 : f32 to vector<8x128xf32>
    %45 = arith.select %43, %41, %44 : vector<8x128xi1>, vector<8x128xf32>
    %c0_21 = arith.constant 0 : index
    %c18 = arith.constant 18 : index
    %46 = vector.load %arg7[%c0_21, %c18] : memref<8x162xf32, #tpu.memory_space<vmem>>, vector<8x128xf32>
    %cst_22 = arith.constant 0.000000e+00 : f32
    %47 = vector.shape_cast %29 : vector<1x128xi1> to vector<1x128xi1>
    %48 = vector.broadcast %47 : vector<1x128xi1> to vector<8x128xi1>
    %49 = vector.broadcast %cst_22 : f32 to vector<8x128xf32>
    %50 = arith.select %48, %46, %49 : vector<8x128xi1>, vector<8x128xf32>
    %c0_23 = arith.constant 0 : index
    %c32 = arith.constant 32 : index
    %51 = vector.load %arg7[%c0_23, %c32] : memref<8x162xf32, #tpu.memory_space<vmem>>, vector<8x128xf32>
    %cst_24 = arith.constant 0.000000e+00 : f32
    %52 = vector.shape_cast %27 : vector<1x128xi1> to vector<1x128xi1>
    %53 = vector.broadcast %52 : vector<1x128xi1> to vector<8x128xi1>
    %54 = vector.broadcast %cst_24 : f32 to vector<8x128xf32>
    %55 = arith.select %53, %51, %54 : vector<8x128xi1>, vector<8x128xf32>
    %c0_25 = arith.constant 0 : index
    %c33 = arith.constant 33 : index
    %56 = vector.load %arg7[%c0_25, %c33] : memref<8x162xf32, #tpu.memory_space<vmem>>, vector<8x128xf32>
    %c0_26 = arith.constant 0 : index
    %c34 = arith.constant 34 : index
    %57 = vector.load %arg7[%c0_26, %c34] : memref<8x162xf32, #tpu.memory_space<vmem>>, vector<8x128xf32>
    %cst_27 = arith.constant 0.000000e+00 : f32
    %58 = vector.shape_cast %29 : vector<1x128xi1> to vector<1x128xi1>
    %59 = vector.broadcast %58 : vector<1x128xi1> to vector<8x128xi1>
    %60 = vector.broadcast %cst_27 : f32 to vector<8x128xf32>
    %61 = arith.select %59, %57, %60 : vector<8x128xi1>, vector<8x128xf32>
    %62 = tpu.concatenate %34, %35, %40, %45, %1, %50, %55, %56, %61 in 0 : vector<8x128xf32>, vector<8x128xf32>, vector<8x128xf32>, vector<8x128xf32>, vector<8x128xf32>, vector<8x128xf32>, vector<8x128xf32>, vector<8x128xf32>, vector<8x128xf32> -> vector<72x128xf32>
    %c0_28 = arith.constant 0 : index
    %c0_29 = arith.constant 0 : index
    %63 = vector.load %arg4[%c0_28, %c0_29] : memref<16x72xf32, #tpu.memory_space<vmem>>, vector<16x72xf32>
    %cst_30 = arith.constant dense<0.000000e+00> : vector<16x128xf32>
    %64 = tpu.matmul %63, %62, %cst_30 {dimension_numbers = #tpu.dot_dimension_numbers<[1], [0], [0], [1], [0, 0, 1, 1], [], []>} : vector<16x72xf32>, vector<72x128xf32>, vector<16x128xf32> -> vector<16x128xf32>
    %c0_31 = arith.constant 0 : index
    %c0_32 = arith.constant 0 : index
    %65 = vector.load %arg5[%c0_31, %c0_32] : memref<16x1xf32, #tpu.memory_space<vmem>>, vector<16x1xf32>
    %66 = vector.broadcast %65 : vector<16x1xf32> to vector<16x128xf32>
    %67 = arith.addf %64, %66 : vector<16x128xf32>
    %68 = vector.extract_strided_slice %67 {offsets = [0, 0], sizes = [8, 128], strides = [1, 1]} : vector<16x128xf32> to vector<8x128xf32>
    %69 = arith.negf %68 : vector<8x128xf32>
    %70 = math.exp %69 : vector<8x128xf32>
    %cst_33 = arith.constant 1.000000e+00 : f32
    %71 = vector.broadcast %cst_33 : f32 to vector<8x128xf32>
    %72 = arith.addf %71, %70 : vector<8x128xf32>
    %73 = arith.divf %71, %72 : vector<8x128xf32>
    %74 = vector.extract_strided_slice %67 {offsets = [8, 0], sizes = [8, 128], strides = [1, 1]} : vector<16x128xf32> to vector<8x128xf32>
    %cst_34 = arith.constant 0.000000e+00 : f32
    %cst_35 = arith.constant 6.000000e+00 : f32
    %75 = vector.broadcast %cst_34 : f32 to vector<8x128xf32>
    %76 = arith.maximumf %75, %74 : vector<8x128xf32>
    %77 = vector.broadcast %cst_35 : f32 to vector<8x128xf32>
    %78 = arith.minimumf %77, %76 : vector<8x128xf32>
    %79 = arith.mulf %1, %73 : vector<8x128xf32>
    %80 = arith.addf %79, %78 : vector<8x128xf32>
    %c0_36 = arith.constant 0 : index
    %c0_37 = arith.constant 0 : index
    %c0_38 = arith.constant 0 : index
    %81 = vector.load %arg6[%c0_36, %c0_37, %c0_38] : memref<1x8x128xf32, #tpu.memory_space<vmem>>, vector<1x8x128xf32>
    %82 = vector.shape_cast %81 : vector<1x8x128xf32> to vector<8x128xf32>
    %83 = vector.shape_cast %80 : vector<8x128xf32> to vector<1x8x128xf32>
    tpu.vector_store %arg6[%c0_36, %c0_37, %c0_38], %83 {strides = array<i32>} : memref<1x8x128xf32, #tpu.memory_space<vmem>>, vector<1x8x128xf32>,
    return
  }
  func.func @transform_0(%arg0: i32, %arg1: i32) -> (i32, i32, i32) {
    %c0_i32 = arith.constant 0 : i32
    %c0_i32_0 = arith.constant 0 : i32
    return %arg0, %c0_i32, %arg1 : i32, i32, i32
  }
  func.func @transform_1(%arg0: i32, %arg1: i32) -> (i32, i32, i32, i32) {
    %c0_i32 = arith.constant 0 : i32
    %c0_i32_0 = arith.constant 0 : i32
    %c0_i32_1 = arith.constant 0 : i32
    return %arg0, %arg1, %c0_i32, %c0_i32_0 : i32, i32, i32, i32
  }
  func.func @transform_2(%arg0: i32, %arg1: i32) -> (i32, i32) {
    %c0_i32 = arith.constant 0 : i32
    %c0_i32_0 = arith.constant 0 : i32
    %c0_i32_1 = arith.constant 0 : i32
    return %c0_i32, %c0_i32_0 : i32, i32
  }
  func.func @transform_3(%arg0: i32, %arg1: i32) -> (i32, i32) {
    %c0_i32 = arith.constant 0 : i32
    %c0_i32_0 = arith.constant 0 : i32
    %c0_i32_1 = arith.constant 0 : i32
    return %c0_i32, %c0_i32_0 : i32, i32
  }
  func.func @transform_4(%arg0: i32, %arg1: i32) -> (i32, i32, i32) {
    %c0_i32 = arith.constant 0 : i32
    %c0_i32_0 = arith.constant 0 : i32
    return %arg0, %c0_i32, %arg1 : i32, i32, i32
  }
}

</mosaic_0001>

<bundles_post_ra>
// kernel: residual_encoded_forward.1
= control target key start
LH: loop header
LB: loop body
LE: loop exit
PB: predicated region body
PF: predicated region fallthrough
CT: control target
= control target key end

     0   :  { %s695_s15 = smov 0   ;;  %s697_s16 = smov 0   ;;  %s814_s0 = inlined_call_operand.vmem [shape: f32[2,8,256], index: 0, kind: input, shape index: {}]   ;;  %s815_s1 = inlined_call_operand.vmem [shape: f32[2,2,8,34], index: 1, kind: input, shape index: {}]   ;;  %s816_s2 = inlined_call_operand.vmem [shape: f32[16,72], index: 2, kind: input, shape index: {}]   ;;  %s817_s3 = inlined_call_operand.vmem [shape: f32[16,1], index: 3, kind: input, shape index: {}]   ;;  %s818_s4 = inlined_call_operand.vmem [shape: f32[2,8,256], index: 4, kind: output, shape index: {}]  }
   0x1   :  { %s699_s17 = smov 0   ;;  %s701_s18 = smov 0  }
   0x2   :  { %s703_s19 = smov 0  }
   0x3 LB: > { %s23_s20 = sadd.s32 1, %s651_s17  ;;  %s26_s21 = sadd.s32 1, %s655_s18  ;;  %s659_s19 = sphi %s703_s19, %s14_s19   ;;  %s655_s18 = sphi %s701_s18, %s826_s18   ;;  %s651_s17 = sphi %s699_s17, %s825_s17   ;;  %s647_s16 = sphi %s697_s16, %s824_s16   ;;  %s643_s15 = sphi %s695_s15, %s823_s15  }
   0x4   : > { %p24_p0 = scmp.ge.s32.totalorder %s23_s20, 2  ;;  %p528_p1 = scmp.ge.s32.totalorder %s659_s19, 1 }
   0x5   : > { %p196_p2 = scmp.lt.s32.totalorder %s659_s19, 5 }
   0x6   : > { %s828_s20 = smov (%p24_p0, %s23_s20), 0  ;;  %s830_s21 = smov (!%p24_p0, %s26_s21), %s655_s18 }
   0x7   : > { %p197_p3 = pnand %p528_p1, %p196_p2  ;;  %p28_p4 = scmp.ge.s32.totalorder %s830_s21, 2 }
   0x8   : > { %p236_p5 = scmp.lt.s32.totalorder (!%p197_p3), %s647_s16, 1  ;;  %p238_p6 = scmp.lt.s32.totalorder (!%p197_p3), %s643_s15, 1 }
   0x9   : > { %s832_s21 = smov (%p28_p4, %s830_s21), 0  ;;  %200 = sbr.rel (%p197_p3) target bundleno = 451 (0x1c3), region = 36 }
   0xa   : > { %s661_s5 = smov (!%p197_p3), 17   ;;  %s662_s6 = smov (!%p197_p3), 96  }
   0xb   : > { %s663_s7 = smov (!%p197_p3), 94   ;;  %s664_s8 = smov (!%p197_p3), 112  }
   0xc   : > { %s665_s9 = smov (!%p197_p3), 110   ;;  %s666_s10 = smov (!%p197_p3), 95  }
   0xd   : > { %s667_s11 = smov (!%p197_p3), 127   ;;  %s668_s12 = smov (!%p197_p3), 126  }
   0xe   : > { %s834_s16 = smov (!%p236_p5, %s647_s16), 1  ;;  %s836_s15 = smov (!%p238_p6, %s643_s15), 1  ;;  %vm262_vm0 = vcmask 138240   ;;  %vm268_vm1 = vcmask 1047688   ;;  %vm271_vm2 = vcmask 277640   ;;  %v273_v6 = vlaneseq  ;;  %v354_v12 = vld [vmem:[%s817_s3] sm:$0xff] }
   0xf   : > { %s529_s22 = sshll.u32 %s834_s16, 1  ;;  %vm334_vm3 = vcmask 769024   ;;  %v355_v13 = vld [vmem:[%s817_s3 + $0x8] sm:$0xff]  ;;  %v669_v16 = vmov 0   ;;  %vm349_vm5 = vcmask 777216   ;;  %vm326_vm6 = vcmask 785408  }
  0x10   : > { %s241_s23 = sadd.s32 %s529_s22, %s836_s15  ;;  %v274_v8 = vand.u32 127, %v273_v6  ;;  %614 = vset.pattern.permute.xlu1 %v669_v16  ;;  %615 = vset.pattern.permute.xlu2 %v669_v16  ;;  %vm318_vm8 = vcmask 900096   ;;  %vm310_vm9 = vcmask 916480   ;;  %vm302_vm10 = vcmask 1031168   ;;  %v352_v37 = vld [vmem:[%s816_s2] sm:$0xff]  ;;  %v353_v38 = vld [vmem:[%s816_s2 + $0x8] sm:$0xff] }
  0x11   : > { %s725_s24 = sshll.u32 %s241_s23, 3  ;;  %616 = vset.pattern.permute.xlu0 %v669_v16  ;;  %vm342_vm11 = vcmask 1039360   ;;  %vm366_vm12 = vcmask 588800  }
  0x12   : > { %s243_s27 = scalar_lea.vmem %s814_s0, %s725_s24  ;;  %s251_s30 = scalar_lea.vmem %s815_s1, %s725_s24  ;;  %v279_v9 = vand.u32 15, %v274_v8 }
  0x13   : > { %v735_v0 = vld [vmem:[%s243_s27] sm:$0xff]  ;;  %s259_s29 = scalar_lea.vmem %s818_s4, %s725_s24 }
  0x14   : > { %v261_v1 = vld [vmem:[%s251_s30] sm:$0xff]  ;;  %265 = vrot.lane.b32.xlu0 %v735_v0, %s661_s5  ;;  %vm746_vm4 = vcmp.ne.s32.totalorder %v279_v9, 15  ;;  %vm760_vm7 = vcmp.ne.s32.totalorder %v279_v9, 0 }
  0x15   : > { %263 = vst.msk [vmem:[#allocation2] sm:$0xff] %vm262_vm0, %v261_v1 }
  0x86   : > { %v266_v2 = vpop.permute.xlu0 %265 }
  0x87   : > { %269 = vst.msk [vmem:[#allocation2] sm:$0xff] %vm268_vm1, %v266_v2 }
  0x88   : > { %270 = vst.msk [vmem:[#allocation2 + $0x8] sm:$0xff] %vm262_vm0, %v266_v2 }
  0x89   : > { %272 = vst.msk [vmem:[#allocation2 + $0x8] sm:$0xff] %vm271_vm2, %v261_v1 }
  0x8e   : > { %v738_v3 = vld [vmem:[#allocation2] sm:$0xff] }
  0x8f   : > { %322 = vrot.lane.b32.xlu2 %v738_v3, %s662_s6  ;;  %330 = vrot.lane.b32.xlu0 %v738_v3, %s663_s7 }
  0x90   : > { %v293_v4 = vld [vmem:[#allocation2 + $0x8] sm:$0xff] }
  0x91   : > { %332 = vrot.lane.b32.xlu1 %v293_v4, %s663_s7  ;;  %v604_v5 = vpack.i.bf16 %v293_v4, %v738_v3 }
  0x97   : > { %306 = vrot.lane.b32.xlu2 %v738_v3, %s664_s8  ;;  %314 = vrot.lane.b32.xlu0 %v738_v3, %s665_s9 }
  0x99   : > { %605 = vrot.lane.b32.xlu1 %v604_v5, %s666_s10 }
  0x9f   : > { %324 = vrot.lane.b32.xlu2 %v293_v4, %s662_s6  ;;  %308 = vrot.lane.b32.xlu0 %v293_v4, %s664_s8 }
  0xa1   : > { %316 = vrot.lane.b32.xlu1 %v293_v4, %s665_s9 }
  0xa7   : > { %610 = vrot.lane.b32.xlu0 %v604_v5, %s667_s11  ;;  %300 = vrot.lane.b32.xlu2 %v293_v4, %s668_s12 }
  0xa9   : > { %298 = vrot.lane.b32.xlu1 %v738_v3, %s668_s12 }
  0xaf   : > { %363 = vperm.xlu2 %615, %v355_v13  }
  0xb1   : > { %358 = vperm.xlu1 %614, %v354_v12  }
  0xe9   : > { %v323_v7 = vpop.permute.xlu2 %322 }
  0xf1   : > { %v307_v14 = vpop.permute.xlu2 %306 }
  0xf9   : > { %v325_v22 = vpop.permute.xlu2 %324 }
  0xfa   : > { %v327_v25 = vsel %vm326_vm6, %v323_v7, %v325_v22 }
 0x101   : > { %v331_v10 = vpop.permute.xlu0 %330  ;;  %v301_v31 = vpop.permute.xlu2 %300 }
 0x103   : > { %v333_v15 = vpop.permute.xlu1 %332 }
 0x104   : > { %v335_v17 = vsel %vm334_vm3, %v331_v10, %v333_v15 }
 0x105   : > { %535 = vmatpush.msk.msra.mxu0 %vm746_vm4, %v335_v17  ;;  %546 = vmatpush.msk.msra.mxu1 %vm746_vm4, %v335_v17 }
 0x109   : > { %v315_v18 = vpop.permute.xlu0 %314  ;;  %v364_v45 = vpop.permute.xlu2 %363 }
 0x10b   : > { %v606_v19 = vpop.permute.xlu1 %605 }
 0x10c   : > { %v608_v20 = vunpack.i.h.bf16 %v606_v19  ;;  %v607_v21 = vunpack.i.l.bf16 %v606_v19 }
 0x10e   : > { %v350_v23 = vsel %vm349_vm5, %v607_v21, %v608_v20 }
 0x10f   : > { %381 = vmatpush.msra.mxu0 %v350_v23  ;;  %547 = vmatpush.msra.mxu1 %v350_v23 }
 0x111   : > { %536 = vmatpush.msk.msra.mxu0 %vm760_vm7, %v327_v25  ;;  %548 = vmatpush.msk.msra.mxu1 %vm760_vm7, %v327_v25  ;;  %v309_v26 = vpop.permute.xlu0 %308 }
 0x112   : > { %v311_v29 = vsel %vm310_vm9, %v307_v14, %v309_v26 }
 0x113   : > { %v317_v27 = vpop.permute.xlu1 %316 }
 0x114   : > { %v319_v28 = vsel %vm318_vm8, %v315_v18, %v317_v27 }
 0x115   : > { %537 = vmatpush.msk.msra.mxu0 %vm746_vm4, %v319_v28  ;;  %549 = vmatpush.msk.msra.mxu1 %vm746_vm4, %v319_v28 }
 0x117   : > { %384 = vmatpush.msra.mxu0 %v735_v0  ;;  %550 = vmatpush.msra.mxu1 %v735_v0 }
 0x119   : > { %538 = vmatpush.msk.msra.mxu0 %vm760_vm7, %v311_v29  ;;  %551 = vmatpush.msk.msra.mxu1 %vm760_vm7, %v311_v29  ;;  %v611_v30 = vpop.permute.xlu0 %610 }
 0x11a   : > { %v613_v32 = vunpack.i.h.bf16 %v611_v30  ;;  %v612_v33 = vunpack.i.l.bf16 %v611_v30 }
 0x11b   : > { %v299_v34 = vpop.permute.xlu1 %298 }
 0x11c   : > { %v303_v35 = vsel %vm302_vm10, %v299_v34, %v301_v31  ;;  %v343_v36 = vsel %vm342_vm11, %v612_v33, %v613_v32 }
 0x11d   : > { %539 = vmatpush.msk.msra.mxu0 %vm746_vm4, %v303_v35  ;;  %552 = vmatpush.msk.msra.mxu1 %vm746_vm4, %v303_v35 }
 0x11f   : > { %387 = vmatpush.msra.mxu0 %v343_v36  ;;  %553 = vmatpush.msra.mxu1 %v343_v36 }
 0x121   : > { %540 = vmatpush.msk.msra.mxu0 %vm760_vm7, %v738_v3  ;;  %554 = vmatpush.msk.msra.mxu1 %vm760_vm7, %v738_v3 }
 0x122   : > { %541 = vmatmul.msk.f32.vlgmr.msra.gmra.mxu0 %vm366_vm12, %v352_v37  ;;  %542 = vmatmul.msk.f32.vlgmr.msra.gmra.mxu1 %vm366_vm12, %v353_v38 }
 0x123   : > { %v359_v39 = vpop.permute.xlu1 %358 }
 0x19f   : > { %v390_v40 = vpop.f32.mrf.mxu0  ;;  %v393_v46 = vpop.f32.mrf.mxu1 }
 0x1a0   : > { %v391_v41 = vadd.f32 %v390_v40, %v359_v39  ;;  %v394_v49 = vadd.f32 %v393_v46, %v364_v45 }
 0x1a2   : > { %v543_v42 = vmul.f32 -1.442695, %v391_v41  ;;  %v415_v54 = vmax.f32 %v394_v49, 0.0 }
 0x1a4   : > { %617 = vpow2.f32 %v543_v42  ;;  %v416_v58 = vmin.f32 %v415_v54, 6.0 }
 0x1aa   : > { %v618_v43 = vpop.eup %617 }
 0x1ab   : > { %v399_v44 = vadd.f32 1.0, %v618_v43 }
 0x1ad   : > { %619 = vrcp.f32 %v399_v44  ;;  %v411_v51 = vand.u32 2147483648, %v399_v44  ;;  %v409_v53 = vand.u32 2147483647, %v399_v44  ;;  %vm405_vm14 = vweird.f32 %v399_v44 }
 0x1af   : > { %v412_v56 = vor.u32 1.1754944e-38, %v411_v51  ;;  %vm410_vm0 = vcmp.eq.f32.partialorder %v409_v53, 8.507059e+37 }
 0x1b3   : > { %v620_v47 = vpop.eup %619 }
 0x1b4   : > { %v401_v48 = vmul.f32 %v620_v47, %v399_v44  ;;  %vm406_vm13 = vweird.f32 %v620_v47 }
 0x1b5   : > { %vm407_vm15 = vmor %vm405_vm14, %vm406_vm13 }
 0x1b6   : > { %v402_v50 = vsub.f32 1.0, %v401_v48 }
 0x1b8   : > { %v403_v52 = vmul.f32 %v620_v47, %v402_v50 }
 0x1ba   : > { %v404_v55 = vadd.f32 %v620_v47, %v403_v52 }
 0x1bc   : > { %v408_v57 = vsel %vm407_vm15, %v620_v47, %v404_v55 }
 0x1bd   : > { %v413_v59 = vsel %vm410_vm0, %v412_v56, %v408_v57 }
 0x1be   : > { %v417_v60 = vmul.f32 %v413_v59, %v735_v0 }
 0x1c0   : > { %v418_v61 = vadd.f32 %v417_v60, %v416_v58 }
 0x1c2   : > { %419 = vst [vmem:[%s259_s29] sm:$0xff] %v418_v61 }
 0x1c3 PF: > { %s14_s19 = sadd.s32 1, %s659_s19   ;;  %s823_s15 = smov %s651_s17 }
 0x1c4   : > { %p11_p7 = scmp.ge.s32.totalorder %s14_s19, 6   ;;  %s824_s16 = smov %s655_s18 }
 0x1c5   : > { %s825_s17 = smov %s828_s20  ;;  %s826_s18 = smov %s832_s21 }
 0x1c6   :  { %13 = sbr.rel (!%p11_p7) target bundleno = 3 (0x3), region = 69 }

</bundles_post_ra>
